<compile_context>
chip_gen: v7x
topology: tpu7x:2x2x1
jax: 0.10.0
libtpu: 0.0.40
codegen_flags: <defaults>
</compile_context>

<pallas_src>
import jax
import jax.numpy as jnp
from jax.experimental import pallas as pl
from jax.experimental.pallas import tpu as pltpu

D_MODEL = 64
HEAD_SIZE = 32


def attention_head_kernel(x_ref, w_ref, b_ref, o_ref):
    # x_ref: (B, S, D)  w_ref: (D, 3H)  b_ref: (1, 1, 3H)  o_ref: (B, S, H)
    h = o_ref.shape[-1]
    x = x_ref[...]

    # Fused QKV projection: a single MXU push with a 3H-wide output.
    qkv = jnp.einsum("bsd,dh->bsh", x, w_ref[...],
                     preferred_element_type=jnp.float32) + b_ref[...]

    # Static slices; the 1/sqrt(d_model) attention scale is already folded
    # into the Q columns of w/b (scale*(xW+b) == x(sW)+(sb)), so no extra
    # VPU multiply is needed here.
    q = qkv[..., 0 * h:1 * h]
    k = qkv[..., 1 * h:2 * h]
    v = qkv[..., 2 * h:3 * h]

    # scores = (Q @ K^T) / sqrt(d_model) -- contraction over the head dim,
    # no explicit transpose of K (batched dot via einsum).
    s = jnp.einsum("bqh,bkh->bqk", q, k, preferred_element_type=jnp.float32)

    # Numerically-stable softmax with an exact divide (restores ~1e-5 accuracy).
    m = jnp.max(s, axis=-1, keepdims=True)
    p = jnp.exp(s - m)
    attn = p / jnp.sum(p, axis=-1, keepdims=True)

    out = jnp.einsum("bqk,bkh->bqh", attn, v,
                     preferred_element_type=jnp.float32)
    o_ref[...] = out.astype(o_ref.dtype)


def pack_attention_params(wq, wk, wv, bq, bk, bv):
    """Fold the attention scale into Q and fuse QKV.  Call ONCE, not per step.

    Weights are (in_features, out_features) so projections are x @ W + b,
    matching nn.Linear's forward.  The PyTorch module divides scores by
    query.weight.size(1) ** 0.5 == sqrt(d_model).
    """
    d_model = wq.shape[0]
    scale = 1.0 / (float(d_model) ** 0.5)
    w_qkv = jnp.concatenate([wq * scale, wk, wv], axis=1)          # (D, 3H)
    b_qkv = jnp.concatenate([bq * scale, bk, bv], axis=0)          # (3H,)
    return w_qkv, b_qkv.reshape(1, 1, -1)                          # (1, 1, 3H)


def attention_head(x, w_qkv, b_qkv):
    B, S, D = x.shape
    h3 = w_qkv.shape[1]
    H = h3 // 3

    return pl.pallas_call(
        attention_head_kernel,
        out_shape=jax.ShapeDtypeStruct((B, S, H), x.dtype),
        grid_spec=pltpu.PrefetchScalarGridSpec(
            num_scalar_prefetch=0,
            grid=(1,),  # everything fits one VMEM-resident step (< 300 KiB)
            in_specs=[
                pl.BlockSpec((B, S, D), lambda i: (0, 0, 0)),
                pl.BlockSpec((D, h3), lambda i: (0, 0)),
                pl.BlockSpec((1, 1, h3), lambda i: (0, 0, 0)),
            ],
            out_specs=pl.BlockSpec((B, S, H), lambda i: (0, 0, 0)),
        ),
        compiler_params=pltpu.CompilerParams(
            dimension_semantics=("arbitrary",)),
    )(x, w_qkv, b_qkv)


def attention_head_ref(x, wq, wk, wv, bq, bk, bv):
    q = x @ wq + bq
    k = x @ wk + bk
    v = x @ wv + bv
    s = (q @ jnp.swapaxes(k, -2, -1)) / (x.shape[-1] ** 0.5)
    return jax.nn.softmax(s, axis=-1) @ v


if __name__ == "__main__":
    key = jax.random.PRNGKey(0)
    kx, kq, kk, kv, kbq, kbk, kbv = jax.random.split(key, 7)

    B, S = 2, 8
    x = jax.random.normal(kx, (B, S, D_MODEL), dtype=jnp.float32)

    # Deterministic parameter init (uniform, torch.nn.Linear-style bound).
    bound = 1.0 / (D_MODEL ** 0.5)
    wq = jax.random.uniform(kq, (D_MODEL, HEAD_SIZE), jnp.float32, -bound, bound)
    wk = jax.random.uniform(kk, (D_MODEL, HEAD_SIZE), jnp.float32, -bound, bound)
    wv = jax.random.uniform(kv, (D_MODEL, HEAD_SIZE), jnp.float32, -bound, bound)
    bq = jax.random.uniform(kbq, (HEAD_SIZE,), jnp.float32, -bound, bound)
    bk = jax.random.uniform(kbk, (HEAD_SIZE,), jnp.float32, -bound, bound)
    bv = jax.random.uniform(kbv, (HEAD_SIZE,), jnp.float32, -bound, bound)

    # Pack (scale-fold + fuse) once, outside the per-call path.
    w_qkv, b_qkv = pack_attention_params(wq, wk, wv, bq, bk, bv)

    out = attention_head(x, w_qkv, b_qkv)
    out = jax.block_until_ready(out)

    ref = attention_head_ref(x, wq, wk, wv, bq, bk, bv)
    assert out.shape == (B, S, HEAD_SIZE)
    # Exact softmax divide -> only f32 matmul round-off remains; 1e-3 has
    # ample headroom on both hardware and interpret mode.
    assert jnp.allclose(out, ref, atol=1e-3, rtol=1e-3)

    print("KERNEL_OK")
</pallas_src>

<mosaic_0001>
module attributes {stable_mosaic.version = 11 : i64} {
  func.func @attention_head_kernel(%arg0: i32, %arg1: memref<2x8x64xf32, #tpu.memory_space<vmem>>, %arg2: memref<64x96xf32, #tpu.memory_space<vmem>>, %arg3: memref<1x1x96xf32, #tpu.memory_space<vmem>>, %arg4: memref<2x8x32xf32, #tpu.memory_space<vmem>>) attributes {dimension_semantics = [#tpu.dimension_semantics<arbitrary>], iteration_bounds = array<i64: 1>, scalar_prefetch = 0 : i64, scratch_operands = 0 : i64, tpu.core_type = #tpu.core_type<tc>, window_params = [{pipeline_mode = #tpu.pipeline_mode<synchronous>, transform_indices = @transform_0, window_bounds = array<i64: 2, 8, 64>}, {pipeline_mode = #tpu.pipeline_mode<synchronous>, transform_indices = @transform_1, window_bounds = array<i64: 64, 96>}, {pipeline_mode = #tpu.pipeline_mode<synchronous>, transform_indices = @transform_2, window_bounds = array<i64: 1, 1, 96>}, {pipeline_mode = #tpu.pipeline_mode<synchronous>, transform_indices = @transform_3, window_bounds = array<i64: 2, 8, 32>}]} {
    %c0 = arith.constant 0 : index
    %c0_0 = arith.constant 0 : index
    %c0_1 = arith.constant 0 : index
    %0 = vector.load %arg1[%c0, %c0_0, %c0_1] : memref<2x8x64xf32, #tpu.memory_space<vmem>>, vector<2x8x64xf32>
    %c0_2 = arith.constant 0 : index
    %c0_3 = arith.constant 0 : index
    %1 = vector.load %arg2[%c0_2, %c0_3] : memref<64x96xf32, #tpu.memory_space<vmem>>, vector<64x96xf32>
    "tpu.trace_start"() <{level = 10 : i32, message = "bsd,dh->bsh"}> : () -> ()
    %cst = arith.constant dense<0.000000e+00> : vector<2x8x96xf32>
    %2 = tpu.matmul %0, %1, %cst {dimension_numbers = #tpu.dot_dimension_numbers<[2], [0], [0, 1], [1], [0, 0, 0, 1, 1, 1], [], []>} : vector<2x8x64xf32>, vector<64x96xf32>, vector<2x8x96xf32> -> vector<2x8x96xf32>
    "tpu.trace_stop"() : () -> ()
    %c0_4 = arith.constant 0 : index
    %c0_5 = arith.constant 0 : index
    %c0_6 = arith.constant 0 : index
    %3 = vector.load %arg3[%c0_4, %c0_5, %c0_6] : memref<1x1x96xf32, #tpu.memory_space<vmem>>, vector<1x1x96xf32>
    %4 = vector.broadcast %3 : vector<1x1x96xf32> to vector<2x8x96xf32>
    %5 = arith.addf %2, %4 : vector<2x8x96xf32>
    %6 = vector.extract_strided_slice %5 {offsets = [0, 0, 0], sizes = [2, 8, 32], strides = [1, 1, 1]} : vector<2x8x96xf32> to vector<2x8x32xf32>
    %7 = vector.extract_strided_slice %5 {offsets = [0, 0, 32], sizes = [2, 8, 32], strides = [1, 1, 1]} : vector<2x8x96xf32> to vector<2x8x32xf32>
    %8 = vector.extract_strided_slice %5 {offsets = [0, 0, 64], sizes = [2, 8, 32], strides = [1, 1, 1]} : vector<2x8x96xf32> to vector<2x8x32xf32>
    "tpu.trace_start"() <{level = 10 : i32, message = "bqh,bkh->bqk"}> : () -> ()
    %cst_7 = arith.constant dense<0.000000e+00> : vector<2x8x8xf32>
    %9 = tpu.matmul %6, %7, %cst_7 {dimension_numbers = #tpu.dot_dimension_numbers<[2], [2], [1], [1], [0, 0, 0, 1, 1, 1], [0], [0]>} : vector<2x8x32xf32>, vector<2x8x32xf32>, vector<2x8x8xf32> -> vector<2x8x8xf32>
    "tpu.trace_stop"() : () -> ()
    %cst_8 = arith.constant dense<0xFF800000> : vector<2x8xf32>
    %10 = vector.multi_reduction <maximumf>, %9, %cst_8 [2] : vector<2x8x8xf32> to vector<2x8xf32>
    %11 = vector.shape_cast %10 : vector<2x8xf32> to vector<2x8x1xf32>
    %12 = vector.broadcast %11 : vector<2x8x1xf32> to vector<2x8x8xf32>
    %13 = arith.subf %9, %12 : vector<2x8x8xf32>
    %14 = math.exp %13 : vector<2x8x8xf32>
    %cst_9 = arith.constant dense<0.000000e+00> : vector<2x8xf32>
    %15 = vector.multi_reduction <add>, %14, %cst_9 [2] : vector<2x8x8xf32> to vector<2x8xf32>
    %16 = vector.shape_cast %15 : vector<2x8xf32> to vector<2x8x1xf32>
    %17 = vector.broadcast %16 : vector<2x8x1xf32> to vector<2x8x8xf32>
    %18 = arith.divf %14, %17 : vector<2x8x8xf32>
    "tpu.trace_start"() <{level = 10 : i32, message = "bqk,bkh->bqh"}> : () -> ()
    %cst_10 = arith.constant dense<0.000000e+00> : vector<2x8x32xf32>
    %19 = tpu.matmul %18, %8, %cst_10 {dimension_numbers = #tpu.dot_dimension_numbers<[2], [1], [1], [2], [0, 0, 0, 1, 1, 2], [0], [0]>} : vector<2x8x8xf32>, vector<2x8x32xf32>, vector<2x8x32xf32> -> vector<2x8x32xf32>
    "tpu.trace_stop"() : () -> ()
    %c0_11 = arith.constant 0 : index
    %c0_12 = arith.constant 0 : index
    %c0_13 = arith.constant 0 : index
    %20 = vector.load %arg4[%c0_11, %c0_12, %c0_13] : memref<2x8x32xf32, #tpu.memory_space<vmem>>, vector<2x8x32xf32>
    tpu.vector_store %arg4[%c0_11, %c0_12, %c0_13], %19 {strides = array<i32>} : memref<2x8x32xf32, #tpu.memory_space<vmem>>, vector<2x8x32xf32>,
    return
  }
  func.func @transform_0(%arg0: i32) -> (i32, i32, i32) {
    %c0_i32 = arith.constant 0 : i32
    %c0_i32_0 = arith.constant 0 : i32
    %c0_i32_1 = arith.constant 0 : i32
    %c0_i32_2 = arith.constant 0 : i32
    return %c0_i32, %c0_i32_0, %c0_i32_1 : i32, i32, i32
  }
  func.func @transform_1(%arg0: i32) -> (i32, i32) {
    %c0_i32 = arith.constant 0 : i32
    %c0_i32_0 = arith.constant 0 : i32
    %c0_i32_1 = arith.constant 0 : i32
    return %c0_i32, %c0_i32_0 : i32, i32
  }
  func.func @transform_2(%arg0: i32) -> (i32, i32, i32) {
    %c0_i32 = arith.constant 0 : i32
    %c0_i32_0 = arith.constant 0 : i32
    %c0_i32_1 = arith.constant 0 : i32
    %c0_i32_2 = arith.constant 0 : i32
    return %c0_i32, %c0_i32_0, %c0_i32_1 : i32, i32, i32
  }
  func.func @transform_3(%arg0: i32) -> (i32, i32, i32) {
    %c0_i32 = arith.constant 0 : i32
    %c0_i32_0 = arith.constant 0 : i32
    %c0_i32_1 = arith.constant 0 : i32
    %c0_i32_2 = arith.constant 0 : i32
    return %c0_i32, %c0_i32_0, %c0_i32_1 : i32, i32, i32
  }
}

</mosaic_0001>

<bundles_post_ra>
// kernel: tpu_custom_call.1
= control target key start
LH: loop header
LB: loop body
LE: loop exit
PB: predicated region body
PF: predicated region fallthrough
CT: control target
= control target key end

     0   :  { %8 = vsyncpa [#allocation3], 0  ;;  %s758_s0 = inlined_call_operand.hbm [shape: f32[2,8,64], index: 0, kind: input, shape index: {}]   ;;  %s759_s1 = inlined_call_operand.hbm [shape: f32[64,96], index: 1, kind: input, shape index: {}]   ;;  %s760_s2 = inlined_call_operand.vmem [shape: f32[1,1,96], index: 2, kind: input, shape index: {}]   ;;  %s761_s3 = inlined_call_operand.hbm [shape: f32[2,8,32], index: 3, kind: output, shape index: {}]  }
   0x1   :  { %9 = vsyncpa [#allocation6], 0 }
   0x2   :  { %10 = vsyncpa [#allocation4], 0  ;;  %s663_s12 = smov [#allocation2]   ;;  %s591_s16 = scalar_lea.hbm %s758_s0, 256 }
   0x3   :  { %s16_s13 = sshll.u32 %s663_s12, 4  ;;  %p592_p0 = scmp.ne.s32.totalorder %s758_s0, %s591_s16  ;;  %s17_s13 = int_to_ptr.vmem [resolvable:$true] %s16_s13 }
   0x4   :  { %p595_p1 = scmp.lt.u32.totalorder %s591_s16, %s758_s0 }
   0x6   :  { %p597_p2 = pnand %p595_p1, %p592_p0 }
   0x8   :  { %600 = shalt.err (!%p597_p2)
}
   0x9   :  { %s601_s21 = scalar_lea.vmem %s17_s13, 256  ;;  %p606_p4 = scmp.lt.s32.totalorder %s17_s13, %s17_s13 }
   0xa   :  { %p602_p3 = scmp.ne.s32.totalorder %s17_s13, %s601_s21  ;;  %p607_p5 = scmp.lt.s32.totalorder %s601_s21, %s601_s21 }
   0xc   :  { %p608_p6 = por %p607_p5, %p606_p4 }
   0xe   :  { %p609_p7 = pnand %p608_p6, %p602_p3 }
  0x10   :  { %612 = shalt.err (!%p609_p7)
}
  0x11   :  { %s664_s22 = smov 128   ;;  %s665_s23 = smov 8  }
  0x12   :  { %22 = dma.hbm_to_vmem [thread:$0]  %s758_s0, 256, %s17_s13, [#allocation3], %s664_s22, %s664_s22, %s665_s23  }
  0x13   :  { %s666_s26 = smov [#allocation5]   ;;  %s613_s30 = scalar_lea.hbm %s759_s1, 1024 }
  0x14   :  { %s28_s27 = sshll.u32 %s666_s26, 4  ;;  %p614_p8 = scmp.ne.s32.totalorder %s759_s1, %s613_s30  ;;  %s29_s27 = int_to_ptr.vmem [resolvable:$true] %s28_s27 }
  0x15   :  { %p617_p9 = scmp.lt.u32.totalorder %s613_s30, %s759_s1 }
  0x17   :  { %p619_p10 = pnand %p617_p9, %p614_p8 }
  0x19   :  { %622 = shalt.err (!%p619_p10)
}
  0x1a   :  { %s623_s8 = scalar_lea.vmem %s29_s27, 1024  ;;  %p628_p12 = scmp.lt.s32.totalorder %s29_s27, %s29_s27 }
  0x1b   :  { %p624_p11 = scmp.ne.s32.totalorder %s29_s27, %s623_s8  ;;  %p629_p13 = scmp.lt.s32.totalorder %s623_s8, %s623_s8 }
  0x1d   :  { %p630_p0 = por %p629_p13, %p628_p12 }
  0x1f   :  { %p631_p1 = pnand %p630_p0, %p624_p11 }
  0x21   :  { %634 = shalt.err (!%p631_p1)
}
  0x22   :  { %34 = dma.hbm_to_vmem [thread:$0]  %s759_s1, 1024, %s29_s27, [#allocation6], %s664_s22, %s664_s22, %s665_s23  }
  0x23   :  { %657 = dma.done.wait [#allocation3], 256  }
  0x24   :  { %658 = vsyncadd [#allocation3], 4294967040 }
  0x25   :  { %659 = dma.done.wait [#allocation6], 1024  }
  0x26   :  { %660 = vsyncadd [#allocation6], 4294966272  ;;  %v45_v0 = vld [vmem:[#allocation5] sm:$0xff]  ;;  %v46_v1 = vld [vmem:[#allocation5 + $0x8] sm:$0xff]  ;;  %vm60_vm0 = vcmask 523264   ;;  %v667_v14 = vmov 0.0  }
  0x27   :  { %v47_v2 = vld [vmem:[#allocation5 + $0x10] sm:$0xff]  ;;  %v558_v3 = vpack.c.bf16 %v46_v1, %v45_v0  ;;  %v48_v4 = vld [vmem:[#allocation5 + $0x18] sm:$0xff]  ;;  %v49_v6 = vld [vmem:[#allocation5 + $0x20] sm:$0xff]  ;;  %538 = vmatprep.subr.mxu1 %v667_v14  ;;  %vm668_vm1 = vmmov 0   ;;  %s669_s11 = smov 96   ;;  %vm145_vm2 = vcmask 261120  }
  0x28   :  { %v562_v5 = vpack.c.bf16 %v48_v4, %v47_v2  ;;  %v50_v7 = vld [vmem:[#allocation5 + $0x28] sm:$0xff]  ;;  %v43_v8 = vld [vmem:[#allocation2] sm:$0xff]  ;;  %v52_v11 = vld [vmem:[#allocation5 + $0x38] sm:$0xff]  ;;  %540 = vmatprep.mubr.msk.f32.mxu1 %vm668_vm1, %v667_v14  ;;  %vm297_vm3 = vcmask 64512   ;;  %s671_s12 = smov [#allocation7]  }
  0x29   :  { %559 = vmatprep.subr.bf16.mxu0 %v558_v3  ;;  %535 = vmatprep.mubr.msk.f32.mxu0 %vm60_vm0, %v43_v8  ;;  %v566_v9 = vpack.c.bf16 %v50_v7, %v49_v6  ;;  %v51_v10 = vld [vmem:[#allocation5 + $0x30] sm:$0xff]  ;;  %v44_v13 = vld [vmem:[#allocation2 + $0x8] sm:$0xff]  ;;  %s479_s13 = sshll.u32 %s671_s12, 4  ;;  %s480_s13 = int_to_ptr.vmem [resolvable:$true] %s479_s13 }
  0x2a   :  { %561 = vmatpush3.bf16.msra.mxu0 %v558_v3  ;;  %v570_v12 = vpack.c.bf16 %v52_v11, %v51_v10  ;;  %v492_v15 = vld [vmem:[%s760_s2] ss:$0 sm:$0xff]  ;;  %s670_s2 = smov 64   ;;  %s635_s14 = scalar_lea.vmem %s480_s13, 256 }
  0x2b   :  { %563 = vmatprep.subr.bf16.mxu0 %v562_v5  ;;  %p636_p2 = scmp.ne.s32.totalorder %s480_s13, %s635_s14  ;;  %p640_p3 = scmp.lt.s32.totalorder %s480_s13, %s480_s13 }
  0x2c   :  { %p641_p4 = scmp.lt.s32.totalorder %s635_s14, %s635_s14 }
  0x2e   :  { %565 = vmatpush3.bf16.msra.mxu0 %v562_v5  ;;  %p642_p5 = por %p641_p4, %p640_p3 }
  0x2f   :  { %567 = vmatprep.subr.bf16.mxu0 %v566_v9 }
  0x30   :  { %p643_p6 = pnand %p642_p5, %p636_p2 }
  0x32   :  { %569 = vmatpush3.bf16.msra.mxu0 %v566_v9 }
  0x33   :  { %571 = vmatprep.subr.bf16.mxu0 %v570_v12 }
  0x36   :  { %573 = vmatpush3.bf16.msra.mxu0 %v570_v12 }
  0x39   :  { %536 = vmatmul.mubr.msk.f32.vlgmr.msra.gmra.mrb[0].mxu0 %vm60_vm0, %v44_v13 }
 0x10c   :  { %v537_v16 = vpop.f32.mrb[0].mxu0 }
 0x10d   :  { %v133_v17 = vpop.f32.mrb[1].mxu0  ;;  %v139_v19 = vadd.f32 %v537_v16, %v492_v15 }
 0x10e   :  { %v134_v18 = vadd.f32 %v492_v15, %v133_v17 }
 0x110   :  { %143 = vrot.lane.b32.xlu0 %v134_v18, %s669_s11 }
 0x114   :  { %221 = vrot.lane.b32.xlu0 %v139_v19, %s669_s11 }
 0x182   :  { %v144_v20 = vpop.permute.xlu0 %143 }
 0x183   :  { %539 = vmatpush3.xpose.msk.msra.mxu1 %vm145_vm2, %v144_v20 }
 0x184   :  { %543 = vmatprep.subr.mxu1 %v667_v14 }
 0x186   :  { %541 = vmatmul.mubr.msk.f32.vlgmr.msra.gmra.mrb[0].mxu1 %vm145_vm2, %v134_v18  ;;  %v222_v21 = vpop.permute.xlu0 %221 }
 0x187   :  { %544 = vmatpush3.xpose.msk.msra.mxu1 %vm145_vm2, %v222_v21  ;;  %545 = vmatprep.mubr.msk.f32.mxu1 %vm668_vm1, %v667_v14 }
 0x188   :  { %548 = vmatprep.subr.mxu1 %v667_v14 }
 0x18a   :  { %546 = vmatmul.mubr.msk.f32.vlgmr.msra.gmra.mrb[2].mxu1 %vm145_vm2, %v139_v19 }
 0x18b   :  { %550 = vmatprep.mubr.msk.f32.mxu1 %vm668_vm1, %v667_v14 }
 0x259   :  { %v216_v22 = vpop.f32.mrb[0].mxu1 }
 0x25a   :  { %v542_v23 = vpop.f32.mrb[1].mxu1  ;;  %v298_v24 = vsel %vm297_vm3, %v216_v22, -inf }
 0x25b   :  { %299 = vmax.xlane.f32.xlu1 %v298_v24 }
 0x25d   :  { %v293_v25 = vpop.f32.mrb[2].mxu1 }
 0x25e   :  { %v547_v26 = vpop.f32.mrb[3].mxu1  ;;  %v301_v27 = vsel %vm297_vm3, %v293_v25, -inf }
 0x25f   :  { %302 = vmax.xlane.f32.xlu1 %v301_v27 }
 0x270   :  { %320 = vrot.lane.b32.xlu1 %v134_v18, %s670_s2 }
 0x2e8   :  { %v300_v28 = vpop.xlane.xlu1 %299 }
 0x2e9   :  { %v304_v29 = vsub.f32 %v216_v22, %v300_v28 }
 0x2eb   :  { %v306_v30 = vmul.f32 1.442695, %v304_v29 }
 0x2ec   :  { %v303_v31 = vpop.xlane.xlu1 %302 }
 0x2ed   :  { %583 = vpow2.f32 %v306_v30  ;;  %v305_v32 = vsub.f32 %v293_v25, %v303_v31 }
 0x2ef   :  { %v308_v33 = vmul.f32 1.442695, %v305_v32 }
 0x2f0   :  { %v321_v34 = vpop.permute.xlu1 %320 }
 0x2f1   :  { %585 = vpow2.f32 %v308_v33  ;;  %549 = vmatpush3.msra.mxu1 %v321_v34 }
 0x2f2   :  { %553 = vmatprep.subr.mxu1 %v667_v14 }
 0x2f7   :  { %v584_v35 = vpop.eup %583 }
 0x2f8   :  { %v310_v36 = vsel %vm297_vm3, %v584_v35, 0.0 }
 0x2f9   :  { %311 = vadd.xlane.f32.xlu0 %v310_v36 }
 0x2fb   :  { %v586_v37 = vpop.eup %585 }
 0x2fc   :  { %v313_v38 = vsel %vm297_vm3, %v586_v37, 0.0 }
 0x2fd   :  { %314 = vadd.xlane.f32.xlu1 %v313_v38 }
 0x30e   :  { %396 = vrot.lane.b32.xlu1 %v139_v19, %s670_s2 }
 0x386   :  { %v312_v39 = vpop.xlane.xlu0 %311 }
 0x387   :  { %587 = vrcp.f32 %v312_v39 }
 0x38a   :  { %v315_v40 = vpop.xlane.xlu1 %314 }
 0x38b   :  { %589 = vrcp.f32 %v315_v40 }
 0x38e   :  { %v397_v43 = vpop.permute.xlu1 %396 }
 0x391   :  { %v588_v41 = vpop.eup %587 }
 0x392   :  { %v317_v42 = vmul.f32 %v588_v41, %v584_v35 }
 0x394   :  { %551 = vmatmul.mubr.msk.f32.vlgmr.msra.gmra.mrb[4].mxu1 %vm297_vm3, %v317_v42 }
 0x395   :  { %v590_v44 = vpop.eup %589  ;;  %554 = vmatpush3.msra.mxu1 %v397_v43  ;;  %555 = vmatprep.mubr.msk.f32.mxu1 %vm668_vm1, %v667_v14 }
 0x396   :  { %v319_v45 = vmul.f32 %v590_v44, %v586_v37 }
 0x398   :  { %556 = vmatmul.mubr.msk.f32.vlgmr.msra.gmra.mrb[6].mxu1 %vm297_vm3, %v319_v45 }
 0x467   :  { %v392_v46 = vpop.f32.mrb[4].mxu1 }
 0x468   :  { %472 = vst.msk [vmem:[#allocation7] sm:$0xff] %vm145_vm2, %v392_v46  ;;  %v552_v47 = vpop.f32.mrb[5].mxu1 }
 0x46b   :  { %v468_v48 = vpop.f32.mrb[6].mxu1 }
 0x46c   :  { %473 = vst.msk [vmem:[#allocation7 + $0x8] sm:$0xff] %vm145_vm2, %v468_v48  ;;  %v557_v49 = vpop.f32.mrb[7].mxu1 }
 0x46d   :  { %646 = shalt.err (!%p643_p6)
}
 0x46e   :  { %s647_s17 = scalar_lea.hbm %s761_s3, 256 }
 0x46f   :  { %p648_p7 = scmp.ne.s32.totalorder %s761_s3, %s647_s17  ;;  %p651_p8 = scmp.lt.u32.totalorder %s647_s17, %s761_s3 }
 0x471   :  { %p653_p9 = pnand %p651_p8, %p648_p7 }
 0x473   :  { %656 = shalt.err (!%p653_p9)
}
 0x474   :  { %485 = dma.vmem_to_hbm [thread:$0]  %s480_s13, 256, %s761_s3, [#allocation4], %s664_s22, %s664_s22, %s665_s23  }
 0x475   :  { %661 = dma.done.wait [#allocation4], 256  }
 0x476   :  { %662 = vsyncadd [#allocation4], 4294967040 }
 0x477   :  { %489 = vsyncpa [#allocation3], 1 }
 0x478   :  { %490 = vsyncpa [#allocation6], 1 }
 0x479   :  { %491 = vsyncpa [#allocation4], 1 }

</bundles_post_ra>
